<compile_context>
chip_gen: v5e
topology: v5e:2x2
jax: 0.10.0
libtpu: 0.0.40
codegen_flags: <defaults>
</compile_context>

<pallas_src>
from functools import partial

import jax
import jax.numpy as jnp
from jax.experimental import pallas as pl
from jax.experimental.pallas import tpu as pltpu

_BLOCK_TARGET_BYTES = 2 * 1024 * 1024     # per streamed block (x4 buffers ~8 MiB)
_FUSED_MAX_BYTES = 4 * 1024 * 1024        # fused path: x read + out write <= ~16 MiB VMEM
_VMEM_LIMIT_BYTES = 32 * 1024 * 1024      # safe on v5e/v6e (128 MiB) and v7x (64 MiB)


def _sigmoid(z):
    # Explicit formula so the fused kernel has a guaranteed Mosaic lowering (EUP exp).
    return 1.0 / (1.0 + jnp.exp(-z))


def _pick_hw_tile(hw, c, itemsize, target_bytes=_BLOCK_TARGET_BYTES, max_tile=4096):
    """Largest multiple of 128 that divides hw, capped by a VMEM byte budget.

    hw is assumed to already be a multiple of 128 (the wrapper pads otherwise).
    """
    if hw <= 128:
        return hw
    budget = max(128, (target_bytes // max(c * itemsize, 1)) // 128 * 128)
    t = min(hw, max_tile, budget)
    t = max((t // 128) * 128, 128)
    while hw % t != 0:
        t -= 128
    return t


# ---------------- Fused single-call path (small x) ----------------

def _fused_kernel(x_ref, w1_ref, b1_ref, w2_ref, b2_ref, o_ref):
    x = x_ref[...]                                        # (B, C, HW)
    pooled = jnp.max(x, axis=-1).astype(jnp.float32)      # (B, C)  AdaptiveMaxPool2d(1)
    h = jnp.maximum(
        jnp.dot(pooled, w1_ref[...], preferred_element_type=jnp.float32) + b1_ref[...],
        0.0)                                              # Linear + ReLU
    fc = _sigmoid(
        jnp.dot(h, w2_ref[...], preferred_element_type=jnp.float32) + b2_ref[...])
    weight = _sigmoid(2.0 * fc)                           # outer sigmoid of (fc + fc)
    o_ref[...] = x * weight[:, :, None].astype(x.dtype)   # Mc * x


def _fused_forward(x3, w1, b1, w2, b2):
    B, C, HW = x3.shape
    vmem_spec = pl.BlockSpec(memory_space=pltpu.MemorySpace.VMEM)
    itemsize = jnp.dtype(x3.dtype).itemsize
    cost = pl.CostEstimate(
        flops=3 * B * C * HW,
        transcendentals=2 * B * C,
        bytes_accessed=2 * B * C * HW * itemsize)
    return pl.pallas_call(
        _fused_kernel,
        out_shape=jax.ShapeDtypeStruct((B, C, HW), x3.dtype),
        in_specs=[vmem_spec] * 5,
        out_specs=vmem_spec,
        compiler_params=pltpu.CompilerParams(vmem_limit_bytes=_VMEM_LIMIT_BYTES),
        cost_estimate=cost,
    )(x3, w1, b1.reshape(1, -1), w2, b2.reshape(1, -1))


# ---------------- Pass 1: global max over H*W (streamed) ----------------

def _max_pool_kernel(x_ref, o_ref, acc_ref):
    # x_ref: (1, C, tile) with tile % 128 == 0
    # acc_ref: (1, C, 128) VMEM scratch, sublane-resident running max (VPU only)
    # o_ref: (1, C, 1), written once per batch at the last hw-tile
    t = pl.program_id(1)
    x = x_ref[...]
    n_chunks = x.shape[-1] // 128
    m = x[:, :, 0:128]
    for j in range(1, n_chunks):                 # static unroll; lane-aligned slices
        m = jnp.maximum(m, x[:, :, j * 128:(j + 1) * 128])

    @pl.when(t == 0)
    def _():
        acc_ref[...] = m

    @pl.when(t > 0)
    def _():
        acc_ref[...] = jnp.maximum(acc_ref[...], m)

    @pl.when(t == pl.num_programs(1) - 1)
    def _():
        # Single cross-lane (XLU) reduce per batch; keeps C on the sublane axis.
        o_ref[...] = jnp.max(acc_ref[...], axis=-1, keepdims=True)


def _global_max_pool(x3):
    B, C, HW = x3.shape
    itemsize = jnp.dtype(x3.dtype).itemsize
    tile = _pick_hw_tile(HW, C, itemsize)
    n_t = HW // tile
    cost = pl.CostEstimate(
        flops=B * C * HW,
        transcendentals=0,
        bytes_accessed=B * C * HW * itemsize + B * C * itemsize)
    pooled = pl.pallas_call(
        _max_pool_kernel,
        out_shape=jax.ShapeDtypeStruct((B, C, 1), x3.dtype),
        grid=(B, n_t),
        in_specs=[pl.BlockSpec((1, C, tile), lambda b, t: (b, 0, t))],
        out_specs=pl.BlockSpec((1, C, 1), lambda b, t: (b, 0, 0)),
        scratch_shapes=[pltpu.VMEM((1, C, 128), x3.dtype)],
        compiler_params=pltpu.CompilerParams(
            dimension_semantics=("parallel", "arbitrary"),
            vmem_limit_bytes=_VMEM_LIMIT_BYTES),
        cost_estimate=cost,
    )(x3)
    return pooled.reshape(B, C)


# ---------------- Pass 2: broadcast-multiply (Mc * x, streamed) ----------------

def _scale_kernel(w_ref, x_ref, o_ref):
    # w_ref: (1, C, 1)   x_ref / o_ref: (1, C, tile) — lane-dense load/store in x.dtype
    o_ref[...] = x_ref[...] * w_ref[...]


def _apply_channel_weight(x3, weight):
    B, C, HW = x3.shape
    itemsize = jnp.dtype(x3.dtype).itemsize
    tile = _pick_hw_tile(HW, C, itemsize)
    n_t = HW // tile
    w3 = weight.astype(x3.dtype).reshape(B, C, 1)
    cost = pl.CostEstimate(
        flops=B * C * HW,
        transcendentals=0,
        bytes_accessed=2 * B * C * HW * itemsize + B * C * itemsize)
    return pl.pallas_call(
        _scale_kernel,
        out_shape=jax.ShapeDtypeStruct((B, C, HW), x3.dtype),
        grid=(B, n_t),
        in_specs=[pl.BlockSpec((1, C, 1), lambda b, t: (b, 0, 0)),
                  pl.BlockSpec((1, C, tile), lambda b, t: (b, 0, t))],
        out_specs=pl.BlockSpec((1, C, tile), lambda b, t: (b, 0, t)),
        compiler_params=pltpu.CompilerParams(
            dimension_semantics=("parallel", "parallel"),
            vmem_limit_bytes=_VMEM_LIMIT_BYTES),
        cost_estimate=cost,
    )(w3, x3)


def _two_pass_forward(x3, w1, b1, w2, b2):
    B, C, HW = x3.shape
    dt = x3.dtype
    # Pad H*W to a multiple of 128 so every streamed block is lane-dense.
    hw_pad = ((HW + 127) // 128) * 128
    if hw_pad != HW:
        pad_val = (jnp.finfo(dt).min if jnp.issubdtype(dt, jnp.floating)
                   else jnp.iinfo(dt).min)
        x3p = jnp.pad(x3, ((0, 0), (0, 0), (0, hw_pad - HW)),
                      constant_values=pad_val)
    else:
        x3p = x3

    pooled = _global_max_pool(x3p).astype(jnp.float32)          # (B, C)

    # Tiny channel-mixing MLP in plain JAX (f32). Both branches of the reference
    # are fc_MaxPool(MaxPool(x)), so their sum is 2 * fc(pooled).
    h = jnp.maximum(pooled @ w1 + b1, 0.0)
    fc = _sigmoid(h @ w2 + b2)
    weight = _sigmoid(2.0 * fc)                                  # (B, C)

    out = _apply_channel_weight(x3p, weight)
    if hw_pad != HW:
        out = out[:, :, :HW]
    return out


# ---------------- Module forward ----------------

@partial(jax.jit, static_argnames=("force_two_pass",))
def channel_attention(x, w1, b1, w2, b2, force_two_pass=False):
    B, C, H, W = x.shape
    x3 = x.reshape(B, C, H * W)
    x_bytes = x.size * jnp.dtype(x.dtype).itemsize
    if (not force_two_pass) and x_bytes <= _FUSED_MAX_BYTES:
        out = _fused_forward(x3, w1, b1, w2, b2)
    else:
        out = _two_pass_forward(x3, w1, b1, w2, b2)
    return out.reshape(B, C, H, W)


# ---------------- Reference + test ----------------

def reference(x, w1, b1, w2, b2):
    # Pure-JAX mirror of the PyTorch forward (both branches use MaxPool + fc_MaxPool).
    pooled = jnp.max(x, axis=(2, 3))

    def fc(v):
        hh = jnp.maximum(v @ w1 + b1, 0.0)
        return jax.nn.sigmoid(hh @ w2 + b2)

    weight = jax.nn.sigmoid(fc(pooled) + fc(pooled))
    return weight[:, :, None, None] * x


if __name__ == "__main__":
    B, C, H, W = 2, 4, 16, 16
    r = 0.5
    hidden = max(1, int(C * r))

    key = jax.random.PRNGKey(0)
    kx, k1, k2, k3, k4, kx2 = jax.random.split(key, 6)
    x = jax.random.normal(kx, (B, C, H, W), jnp.float32)

    s1 = 1.0 / (C ** 0.5)
    s2 = 1.0 / (hidden ** 0.5)
    w1 = jax.random.uniform(k1, (C, hidden), jnp.float32, -s1, s1)
    b1 = jax.random.uniform(k2, (hidden,), jnp.float32, -s1, s1)
    w2 = jax.random.uniform(k3, (hidden, C), jnp.float32, -s2, s2)
    b2 = jax.random.uniform(k4, (C,), jnp.float32, -s2, s2)

    ref = reference(x, w1, b1, w2, b2)

    # Fused single-pallas_call path (default dispatch for small x).
    out_fused = jax.block_until_ready(channel_attention(x, w1, b1, w2, b2))
    assert out_fused.shape == (B, C, H, W)
    assert jnp.allclose(out_fused, ref, atol=1e-5, rtol=1e-5)

    # Streaming two-pass path (forced) — same semantics, tiled kernels.
    out_tiled = jax.block_until_ready(
        channel_attention(x, w1, b1, w2, b2, force_two_pass=True))
    assert jnp.allclose(out_tiled, ref, atol=1e-5, rtol=1e-5)

    # Non-128-aligned spatial size exercises the lane-padding path of pass 1/2.
    x2 = jax.random.normal(kx2, (B, C, 10, 10), jnp.float32)
    ref2 = reference(x2, w1, b1, w2, b2)
    out2 = jax.block_until_ready(
        channel_attention(x2, w1, b1, w2, b2, force_two_pass=True))
    assert jnp.allclose(out2, ref2, atol=1e-5, rtol=1e-5)

    print("KERNEL_OK")
</pallas_src>

<mosaic_0001>
module attributes {stable_mosaic.version = 11 : i64} {
  func.func @_fused_kernel(%arg0: memref<2x4x256xf32, #tpu.memory_space<vmem>>, %arg1: memref<4x2xf32, #tpu.memory_space<vmem>>, %arg2: memref<1x2xf32, #tpu.memory_space<vmem>>, %arg3: memref<2x4xf32, #tpu.memory_space<vmem>>, %arg4: memref<1x4xf32, #tpu.memory_space<vmem>>, %arg5: memref<2x4x256xf32, #tpu.memory_space<vmem>>) attributes {dimension_semantics = [], scalar_prefetch = 0 : i64, scratch_operands = 0 : i64, tpu.core_type = #tpu.core_type<tc>} {
    %c0 = arith.constant 0 : index
    %c0_0 = arith.constant 0 : index
    %c0_1 = arith.constant 0 : index
    %0 = vector.load %arg0[%c0, %c0_0, %c0_1] : memref<2x4x256xf32, #tpu.memory_space<vmem>>, vector<2x4x256xf32>
    %cst = arith.constant dense<0xFF800000> : vector<2x4xf32>
    %1 = vector.multi_reduction <maximumf>, %0, %cst [2] : vector<2x4x256xf32> to vector<2x4xf32>
    %c0_2 = arith.constant 0 : index
    %c0_3 = arith.constant 0 : index
    %2 = vector.load %arg1[%c0_2, %c0_3] : memref<4x2xf32, #tpu.memory_space<vmem>>, vector<4x2xf32>
    %cst_4 = arith.constant dense<0.000000e+00> : vector<2x2xf32>
    %3 = tpu.matmul %1, %2, %cst_4 {dimension_numbers = #tpu.dot_dimension_numbers<[1], [0], [0], [1], [0, 0, 1, 1], [], []>} : vector<2x4xf32>, vector<4x2xf32>, vector<2x2xf32> -> vector<2x2xf32>
    %c0_5 = arith.constant 0 : index
    %c0_6 = arith.constant 0 : index
    %4 = vector.load %arg2[%c0_5, %c0_6] : memref<1x2xf32, #tpu.memory_space<vmem>>, vector<1x2xf32>
    %5 = vector.broadcast %4 : vector<1x2xf32> to vector<2x2xf32>
    %6 = arith.addf %3, %5 : vector<2x2xf32>
    %cst_7 = arith.constant 0.000000e+00 : f32
    %7 = vector.broadcast %cst_7 : f32 to vector<2x2xf32>
    %8 = arith.maximumf %6, %7 : vector<2x2xf32>
    %c0_8 = arith.constant 0 : index
    %c0_9 = arith.constant 0 : index
    %9 = vector.load %arg3[%c0_8, %c0_9] : memref<2x4xf32, #tpu.memory_space<vmem>>, vector<2x4xf32>
    %cst_10 = arith.constant dense<0.000000e+00> : vector<2x4xf32>
    %10 = tpu.matmul %8, %9, %cst_10 {dimension_numbers = #tpu.dot_dimension_numbers<[1], [0], [0], [1], [0, 0, 1, 1], [], []>} : vector<2x2xf32>, vector<2x4xf32>, vector<2x4xf32> -> vector<2x4xf32>
    %c0_11 = arith.constant 0 : index
    %c0_12 = arith.constant 0 : index
    %11 = vector.load %arg4[%c0_11, %c0_12] : memref<1x4xf32, #tpu.memory_space<vmem>>, vector<1x4xf32>
    %12 = vector.broadcast %11 : vector<1x4xf32> to vector<2x4xf32>
    %13 = arith.addf %10, %12 : vector<2x4xf32>
    %cst_13 = arith.constant 0.000000e+00 : f32
    %14 = vector.broadcast %cst_13 : f32 to vector<2x4xf32>
    %15 = arith.subf %14, %13 : vector<2x4xf32>
    %16 = math.exp %15 : vector<2x4xf32>
    %cst_14 = arith.constant 1.000000e+00 : f32
    %17 = vector.broadcast %cst_14 : f32 to vector<2x4xf32>
    %18 = arith.addf %17, %16 : vector<2x4xf32>
    %cst_15 = arith.constant 1.000000e+00 : f32
    %19 = vector.broadcast %cst_15 : f32 to vector<2x4xf32>
    %20 = arith.divf %19, %18 : vector<2x4xf32>
    %cst_16 = arith.constant 2.000000e+00 : f32
    %21 = vector.broadcast %cst_16 : f32 to vector<2x4xf32>
    %22 = arith.mulf %21, %20 : vector<2x4xf32>
    %cst_17 = arith.constant 0.000000e+00 : f32
    %23 = vector.broadcast %cst_17 : f32 to vector<2x4xf32>
    %24 = arith.subf %23, %22 : vector<2x4xf32>
    %25 = math.exp %24 : vector<2x4xf32>
    %cst_18 = arith.constant 1.000000e+00 : f32
    %26 = vector.broadcast %cst_18 : f32 to vector<2x4xf32>
    %27 = arith.addf %26, %25 : vector<2x4xf32>
    %cst_19 = arith.constant 1.000000e+00 : f32
    %28 = vector.broadcast %cst_19 : f32 to vector<2x4xf32>
    %29 = arith.divf %28, %27 : vector<2x4xf32>
    %30 = vector.shape_cast %29 : vector<2x4xf32> to vector<2x4x1xf32>
    %31 = vector.broadcast %30 : vector<2x4x1xf32> to vector<2x4x256xf32>
    %32 = arith.mulf %0, %31 : vector<2x4x256xf32>
    %c0_20 = arith.constant 0 : index
    %c0_21 = arith.constant 0 : index
    %c0_22 = arith.constant 0 : index
    %33 = vector.load %arg5[%c0_20, %c0_21, %c0_22] : memref<2x4x256xf32, #tpu.memory_space<vmem>>, vector<2x4x256xf32>
    tpu.vector_store %arg5[%c0_20, %c0_21, %c0_22], %32 {strides = array<i32>} : memref<2x4x256xf32, #tpu.memory_space<vmem>>, vector<2x4x256xf32>,
    return
  }
}

</mosaic_0001>

<bundles_post_ra>
// kernel: channel_attention.1
= control target key start
LH: loop header
LB: loop body
LE: loop exit
PB: predicated region body
PF: predicated region fallthrough
CT: control target
= control target key end

     0   :  { %vm35_vm0 = vcmask 1043456   ;;  %v53_v14 = vlaneseq  ;;  %vm57_vm1 = vcmask 1041409   ;;  %vm59_vm2 = vcmask 31744   ;;  %s277_s0 = inlined_call_operand.vmem [shape: f32[2,4,256], index: 0, kind: input, shape index: {}]   ;;  %s278_s2 = inlined_call_operand.vmem [shape: f32[1,2], index: 2, kind: input, shape index: {}]   ;;  %s279_s1 = inlined_call_operand.vmem [shape: f32[4,2], index: 1, kind: input, shape index: {}]   ;;  %s280_s4 = inlined_call_operand.vmem [shape: f32[1,4], index: 4, kind: input, shape index: {}]   ;;  %s281_s3 = inlined_call_operand.vmem [shape: f32[2,4], index: 3, kind: input, shape index: {}]   ;;  %s282_s5 = inlined_call_operand.vmem [shape: f32[2,4,256], index: 5, kind: output, shape index: {}]  }
   0x1   :  { %v243_v0 = vld [vmem:[%s277_s0] sm:$0xff]  ;;  %v248_v1 = vld [vmem:[%s277_s0 + $0x8] sm:$0xff]  ;;  %vm95_vm3 = vcmask 1041408   ;;  %vm91_vm4 = vcmask 15360   ;;  %v209_v60 = vmov 839922192  }
   0x2   :  { %24 = vst [vmem:[#allocation1] ss:$2 sm:$0xff] %v243_v0  ;;  %v46_v12 = vld [vmem:[%s279_s1] sm:$0xf]  ;;  %v54_v15 = vand.u32 127, %v53_v14  ;;  %v160_v29 = vshrl.u32 %v53_v14, 7  ;;  %v175_v61 = vunpack.c.l.s4 %v209_v60 }
   0x3   :  { %28 = vst [vmem:[#allocation1 + $0x10] ss:$2 sm:$0xff] %v248_v1  ;;  %192 = vmatpush.msk.msra.mxu0 %vm35_vm0, %v46_v12  ;;  %v86_v20 = vld [vmem:[%s281_s3] sm:$0x3] }
   0x4   :  { %194 = vmatpush.msk.msra.mxu1 %vm95_vm3, %v86_v20  ;;  %v199_v21 = vld [vmem:[%s278_s2] ss:$0 sm:$0xff]  ;;  %197 = vset.pattern.permute.xlu1 %v160_v29  ;;  %v176_v62 = vunpack.c.0.s8 %v175_v61 }
   0x5   :  { %v200_v25 = vld [vmem:[%s280_s4] ss:$0 sm:$0xff]  ;;  %198 = vset.pattern.permute.xlu0 %v160_v29 }
   0x9   :  { %v25_v2 = vld.sshfl [vmem:[#allocation1] sm:$0xff pattern:$0x75316420]  ;;  %v26_v3 = vld.sshfl [vmem:[#allocation1 + $0x8] sm:$0xff pattern:$0x75316420] }
   0xa   :  { %v36_v4 = vsel %vm35_vm0, %v25_v2, -inf  ;;  %v37_v5 = vsel %vm35_vm0, %v26_v3, -inf  ;;  %v29_v7 = vld.sshfl [vmem:[#allocation1 + $0x10] sm:$0xff pattern:$0x75316420] }
   0xb   :  { %v38_v6 = vmax.f32 %v36_v4, %v37_v5  ;;  %v30_v8 = vld.sshfl [vmem:[#allocation1 + $0x18] sm:$0xff pattern:$0x75316420]  ;;  %v41_v9 = vsel %vm35_vm0, %v29_v7, -inf }
   0xc   :  { %v42_v10 = vsel %vm35_vm0, %v30_v8, -inf }
   0xd   :  { %39 = vmax.xlane.f32.xlu0 %v38_v6  ;;  %v43_v11 = vmax.f32 %v41_v9, %v42_v10 }
  0x15   :  { %44 = vmax.xlane.f32.xlu0 %v43_v11 }
  0x80   :  { %v40_v13 = vpop.xlane.xlu0 %39 }
  0x81   :  { %v55_v17 = vperm.slane %v40_v13, %v54_v15 }
  0x88   :  { %v45_v16 = vpop.xlane.xlu0 %44 }
  0x89   :  { %v56_v18 = vperm.slane %v45_v16, %v54_v15 }
  0x8b   :  { %v58_v19 = vsel %vm57_vm1, %v56_v18, %v55_v17 }
  0x8c   :  { %193 = vmatmul.msk.f32.vlgmr.msra.gmra.mxu0 %vm59_vm2, %v58_v19 }
 0x109   :  { %v82_v22 = vpop.f32.mrf.mxu0 }
 0x10a   :  { %v83_v23 = vadd.f32 %v199_v21, %v82_v22 }
 0x10c   :  { %v85_v24 = vmax.f32 %v83_v23, 0.0 }
 0x10e   :  { %195 = vmatmul.msk.f32.vlgmr.msra.gmra.mxu1 %vm91_vm4, %v85_v24 }
 0x18b   :  { %v116_v26 = vpop.f32.mrf.mxu1 }
 0x18c   :  { %v117_v27 = vadd.f32 %v200_v25, %v116_v26 }
 0x18e   :  { %v119_v28 = vsub.f32 0.0, %v117_v27 }
 0x190   :  { %v120_v30 = vmul.f32 1.442695, %v119_v28 }
 0x192   :  { %201 = vpow2.f32 %v120_v30 }
 0x198   :  { %v202_v31 = vpop.eup %201 }
 0x199   :  { %v122_v32 = vadd.f32 1.0, %v202_v31 }
 0x19b   :  { %203 = vrcp.f32 %v122_v32  ;;  %v134_v36 = vand.u32 2147483648, %v122_v32  ;;  %v132_v38 = vand.u32 2147483647, %v122_v32  ;;  %vm128_vm6 = vweird.f32 %v122_v32 }
 0x19d   :  { %v135_v40 = vor.u32 1.1754944e-38, %v134_v36  ;;  %vm133_vm8 = vcmp.eq.f32.partialorder %v132_v38, 8.507059e+37 }
 0x1a1   :  { %v204_v33 = vpop.eup %203 }
 0x1a2   :  { %v124_v34 = vmul.f32 %v204_v33, %v122_v32  ;;  %vm129_vm5 = vweird.f32 %v204_v33 }
 0x1a3   :  { %vm130_vm7 = vmor %vm128_vm6, %vm129_vm5 }
 0x1a4   :  { %v125_v35 = vsub.f32 1.0, %v124_v34 }
 0x1a6   :  { %v126_v37 = vmul.f32 %v204_v33, %v125_v35 }
 0x1a8   :  { %v127_v39 = vadd.f32 %v204_v33, %v126_v37 }
 0x1aa   :  { %v131_v41 = vsel %vm130_vm7, %v204_v33, %v127_v39 }
 0x1ab   :  { %v136_v42 = vsel %vm133_vm8, %v135_v40, %v131_v41 }
 0x1ac   :  { %v138_v43 = vmul.f32 2.0, %v136_v42 }
 0x1ae   :  { %v139_v44 = vsub.f32 0.0, %v138_v43 }
 0x1b0   :  { %v140_v45 = vmul.f32 1.442695, %v139_v44 }
 0x1b2   :  { %205 = vpow2.f32 %v140_v45 }
 0x1b8   :  { %v206_v46 = vpop.eup %205 }
 0x1b9   :  { %v142_v47 = vadd.f32 1.0, %v206_v46 }
 0x1bb   :  { %207 = vrcp.f32 %v142_v47  ;;  %v154_v51 = vand.u32 2147483648, %v142_v47  ;;  %v152_v53 = vand.u32 2147483647, %v142_v47  ;;  %vm148_vm10 = vweird.f32 %v142_v47 }
 0x1bd   :  { %v155_v55 = vor.u32 1.1754944e-38, %v154_v51  ;;  %vm153_vm12 = vcmp.eq.f32.partialorder %v152_v53, 8.507059e+37 }
 0x1c1   :  { %v208_v48 = vpop.eup %207 }
 0x1c2   :  { %v144_v49 = vmul.f32 %v208_v48, %v142_v47  ;;  %vm149_vm9 = vweird.f32 %v208_v48 }
 0x1c3   :  { %vm150_vm11 = vmor %vm148_vm10, %vm149_vm9 }
 0x1c4   :  { %v145_v50 = vsub.f32 1.0, %v144_v49 }
 0x1c6   :  { %v146_v52 = vmul.f32 %v208_v48, %v145_v50 }
 0x1c8   :  { %v147_v54 = vadd.f32 %v208_v48, %v146_v52 }
 0x1ca   :  { %v151_v56 = vsel %vm150_vm11, %v208_v48, %v147_v54 }
 0x1cb   :  { %v156_v57 = vsel %vm153_vm12, %v155_v55, %v151_v56 }
 0x1cc   :  { %v158_v58 = vperm.slane %v156_v57, 0  ;;  %v165_v59 = vperm.slane %v156_v57, 1 }
 0x1ce   :  { %163 = vperm.xlu1 %197, %v158_v58  }
 0x1d6   :  { %170 = vperm.xlu1 %197, %v165_v59  }
 0x240   :  { %v164_v63 = vpop.permute.xlu1 %163 }
 0x241   :  { %v177_v2 = vperm.slane %v164_v63, %v176_v62 }
 0x243   :  { %v184_v3 = vmul.f32 %v177_v2, %v243_v0 }
 0x245   :  { %186 = vst [vmem:[%s282_s5] sm:$0xff] %v184_v3 }
 0x248   :  { %v171_v4 = vpop.permute.xlu1 %170 }
 0x249   :  { %v181_v5 = vperm.slane %v171_v4, %v176_v62 }
 0x24b   :  { %v185_v6 = vmul.f32 %v181_v5, %v248_v1 }
 0x24d   :  { %187 = vst [vmem:[%s282_s5 + $0x8] sm:$0xff] %v185_v6 }

</bundles_post_ra>
